<compile_context>
chip_gen: v7x
topology: tpu7x:2x2x1
jax: 0.10.0
libtpu: 0.0.40
codegen_flags: <defaults>
</compile_context>

<pallas_src>
import jax
import jax.numpy as jnp
from jax.experimental import pallas as pl
from jax.experimental.pallas import tpu as pltpu


def _cdiv(a, b):
    return (a + b - 1) // b


def _round_up(n, m):
    return _cdiv(n, m) * m


def mlp_kernel(x_ref, w1_ref, b1_ref, w2_ref, b2_ref, w3_ref, b3_ref, out_ref):
    """Fused 3-layer MLP on one batch tile: (Linear -> ReLU) x2 -> Linear."""
    cdt = w1_ref.dtype  # MXU compute dtype (bf16 by default, f32 for the exact path)
    x = x_ref[...].astype(cdt)
    # Layer 1: 784 -> 128, ReLU (f32 accumulation, f32 bias add)
    h1 = jnp.dot(x, w1_ref[...], preferred_element_type=jnp.float32) + b1_ref[...]
    h1 = jnp.maximum(h1, 0.0)
    # Layer 2: 128 -> 64, ReLU
    h2 = jnp.dot(h1.astype(cdt), w2_ref[...], preferred_element_type=jnp.float32) + b2_ref[...]
    h2 = jnp.maximum(h2, 0.0)
    # Output layer: 64 -> 128 (zero-padded from 5), logits, no activation
    logits = jnp.dot(h2.astype(cdt), w3_ref[...], preferred_element_type=jnp.float32) + b3_ref[...]
    out_ref[...] = logits.astype(out_ref.dtype)


def torch_mlp_forward(x, params, *, block_batch=2048, compute_dtype=jnp.bfloat16):
    """Pallas wrapper reproducing TorchMLP.forward semantics.

    Args:
      x: (B, 784) float32, or any (B, ...) tensor that flattens to (B, 784).
      params: dict with w1 (784,128), b1 (1,128), w2 (128,64), b2 (1,64),
              w3 (64,5), b3 (1,5)   stored as (in_dim, out_dim) so y = x @ W + b
              (mathematically identical to PyTorch's x @ W.T with W (out, in)).
      block_batch: max batch-tile size (rows per grid step).
      compute_dtype: MXU operand dtype (bf16 default; f32 for an exact path).
    Returns:
      logits: (B, 5) float32.
    """
    if x.ndim > 2:
        x = x.reshape(x.shape[0], -1)
    x = x.astype(jnp.float32)
    B, in_dim = x.shape

    h1_dim = params["w1"].shape[1]          # 128
    h2_dim = params["w2"].shape[1]          # 64
    out_dim = params["w3"].shape[1]         # 5
    out_pad = _round_up(out_dim, 128)       # 5 -> 128 (lane-dense output stores)

    # Parameter prep: weights in compute dtype, biases stay f32 (added post-accumulation).
    w1 = params["w1"].astype(compute_dtype)
    b1 = params["b1"].reshape(1, h1_dim).astype(jnp.float32)
    w2 = params["w2"].astype(compute_dtype)
    b2 = params["b2"].reshape(1, h2_dim).astype(jnp.float32)
    w3 = jnp.pad(params["w3"].astype(compute_dtype), ((0, 0), (0, out_pad - out_dim)))
    b3 = jnp.pad(params["b3"].reshape(1, out_dim).astype(jnp.float32),
                 ((0, 0), (0, out_pad - out_dim)))

    # Batch tiling: pad only to a multiple of 8 per step; force >=2 steps when possible so
    # the "parallel" axis shards across both TensorCores on v7x.
    b8 = _round_up(B, 8)
    g = _cdiv(b8, block_batch)
    if b8 >= 16:
        g = max(g, 2)
    tb = _round_up(_cdiv(b8, g), 8)
    b_pad = g * tb
    xp = jnp.pad(x, ((0, b_pad - B), (0, 0))) if b_pad != B else x
    grid = (g,)

    # VMEM budget: double-buffered x/out tiles + weights + margin, capped for v7x (64 MiB).
    itemsize = jnp.dtype(compute_dtype).itemsize
    w_bytes = (itemsize * (w1.size + w2.size + w3.size)
               + 4 * (b1.size + b2.size + b3.size))
    x_tile_bytes = tb * _round_up(in_dim, 128) * 4     # x kept f32 in HBM/VMEM
    out_tile_bytes = tb * out_pad * 4
    vmem_limit = min(2 * (x_tile_bytes + out_tile_bytes) + 2 * w_bytes + (8 << 20),
                     48 << 20)

    cost = pl.CostEstimate(
        flops=2 * b_pad * (in_dim * h1_dim + h1_dim * h2_dim + h2_dim * out_pad),
        bytes_accessed=b_pad * in_dim * 4 + b_pad * out_pad * 4 + int(w_bytes),
        transcendentals=0,
    )

    def _run(single_buffer_weights):
        if single_buffer_weights:
            # Constant index_map => fetched once; one VMEM copy is enough.
            resident = lambda a: pl.BlockSpec(
                a.shape, lambda i: (0,) * a.ndim, pipeline_mode=pl.Buffered(1))
        else:
            resident = lambda a: pl.BlockSpec(a.shape, lambda i: (0,) * a.ndim)
        return pl.pallas_call(
            mlp_kernel,
            out_shape=jax.ShapeDtypeStruct((b_pad, out_pad), jnp.float32),
            grid=grid,
            in_specs=[
                # x: tiled over batch; full (unpadded) 784 last dim == full array dim.
                pl.BlockSpec((tb, in_dim), lambda i: (i, 0)),
                resident(w1), resident(b1),
                resident(w2), resident(b2),
                resident(w3), resident(b3),
            ],
            out_specs=pl.BlockSpec((tb, out_pad), lambda i: (i, 0)),
            compiler_params=pltpu.CompilerParams(
                dimension_semantics=("parallel",),          # megacore sharding on v7x
                vmem_limit_bytes=int(vmem_limit),
            ),
            cost_estimate=cost,
        )(xp, w1, b1, w2, b2, w3, b3)

    try:
        out_padded = _run(True)
    except Exception:
        # Fallback if single-buffered weight specs are rejected by this JAX/Mosaic version.
        out_padded = _run(False)

    # Strip batch and lane padding back to the PyTorch-visible shape.
    return out_padded[:B, :out_dim]


def init_params(key, input_dim=784, hidden_dims=(128, 64), output_dim=5):
    """Deterministic init mimicking nn.Linear's default (Kaiming-uniform-ish)."""
    dims = [input_dim, *hidden_dims, output_dim]
    params = {}
    for i, (fan_in, fan_out) in enumerate(zip(dims[:-1], dims[1:]), start=1):
        key, kw, kb = jax.random.split(key, 3)
        bound = 1.0 / (fan_in ** 0.5)
        params[f"w{i}"] = jax.random.uniform(
            kw, (fan_in, fan_out), jnp.float32, -bound, bound)
        params[f"b{i}"] = jax.random.uniform(
            kb, (1, fan_out), jnp.float32, -bound, bound)
    return params


def reference_forward(x, params):
    """Plain-JAX reference for correctness check."""
    if x.ndim > 2:
        x = x.reshape(x.shape[0], -1)
    h = jnp.maximum(x @ params["w1"] + params["b1"], 0.0)
    h = jnp.maximum(h @ params["w2"] + params["b2"], 0.0)
    return h @ params["w3"] + params["b3"]


if __name__ == "__main__":
    key = jax.random.PRNGKey(0)
    key, kx1, kx2 = jax.random.split(key, 3)
    params = init_params(key)

    # Small batch of flattened 28x28 "images": (B, 784)
    B = 8
    x = jax.random.normal(kx1, (B, 784), dtype=jnp.float32)
    ref = reference_forward(x, params)

    # Exact (f32 MXU emulation) path.
    logits_f32 = jax.block_until_ready(
        torch_mlp_forward(x, params, compute_dtype=jnp.float32))
    assert logits_f32.shape == (B, 5), logits_f32.shape
    assert jnp.allclose(logits_f32, ref, atol=5e-3, rtol=5e-3), "f32 path mismatch vs reference"

    # Default bf16-operand / f32-accumulation path (looser tolerance).
    logits_bf16 = jax.block_until_ready(torch_mlp_forward(x, params))
    assert logits_bf16.shape == (B, 5), logits_bf16.shape
    assert jnp.allclose(logits_bf16, ref, atol=3e-2, rtol=3e-2), "bf16 path mismatch vs reference"

    # Ragged batch (exercises batch padding) with 4-D input (exercises flatten).
    B2 = 5
    x2 = jax.random.normal(kx2, (B2, 1, 28, 28), dtype=jnp.float32)
    logits2 = jax.block_until_ready(torch_mlp_forward(x2, params))
    ref2 = reference_forward(x2, params)
    assert logits2.shape == (B2, 5), logits2.shape
    assert jnp.allclose(logits2, ref2, atol=3e-2, rtol=3e-2), "mismatch vs reference (B=5)"

    print("KERNEL_OK")
</pallas_src>

<mosaic_0001>
module attributes {stable_mosaic.version = 11 : i64} {
  func.func @mlp_kernel(%arg0: i32, %arg1: memref<8x784xf32, #tpu.memory_space<vmem>>, %arg2: memref<784x128xf32, #tpu.memory_space<vmem>>, %arg3: memref<1x128xf32, #tpu.memory_space<vmem>>, %arg4: memref<128x64xf32, #tpu.memory_space<vmem>>, %arg5: memref<1x64xf32, #tpu.memory_space<vmem>>, %arg6: memref<64x128xf32, #tpu.memory_space<vmem>>, %arg7: memref<1x128xf32, #tpu.memory_space<vmem>>, %arg8: memref<8x128xf32, #tpu.memory_space<vmem>>) attributes {dimension_semantics = [#tpu.dimension_semantics<parallel>], iteration_bounds = array<i64: 1>, scalar_prefetch = 0 : i64, scratch_operands = 0 : i64, tpu.core_type = #tpu.core_type<tc>, window_params = [{transform_indices = @transform_0, window_bounds = array<i64: 8, 784>}, {pipeline_mode = #tpu.pipeline_mode<synchronous>, transform_indices = @transform_1, window_bounds = array<i64: 784, 128>}, {pipeline_mode = #tpu.pipeline_mode<synchronous>, transform_indices = @transform_2, window_bounds = array<i64: 1, 128>}, {pipeline_mode = #tpu.pipeline_mode<synchronous>, transform_indices = @transform_3, window_bounds = array<i64: 128, 64>}, {pipeline_mode = #tpu.pipeline_mode<synchronous>, transform_indices = @transform_4, window_bounds = array<i64: 1, 64>}, {pipeline_mode = #tpu.pipeline_mode<synchronous>, transform_indices = @transform_5, window_bounds = array<i64: 64, 128>}, {pipeline_mode = #tpu.pipeline_mode<synchronous>, transform_indices = @transform_6, window_bounds = array<i64: 1, 128>}, {transform_indices = @transform_7, window_bounds = array<i64: 8, 128>}]} {
    %c0 = arith.constant 0 : index
    %c0_0 = arith.constant 0 : index
    %0 = vector.load %arg1[%c0, %c0_0] : memref<8x784xf32, #tpu.memory_space<vmem>>, vector<8x784xf32>
    %c0_1 = arith.constant 0 : index
    %c0_2 = arith.constant 0 : index
    %1 = vector.load %arg2[%c0_1, %c0_2] : memref<784x128xf32, #tpu.memory_space<vmem>>, vector<784x128xf32>
    %cst = arith.constant dense<0.000000e+00> : vector<8x128xf32>
    %2 = tpu.matmul %0, %1, %cst {dimension_numbers = #tpu.dot_dimension_numbers<[1], [0], [0], [1], [0, 0, 1, 1], [], []>} : vector<8x784xf32>, vector<784x128xf32>, vector<8x128xf32> -> vector<8x128xf32>
    %c0_3 = arith.constant 0 : index
    %c0_4 = arith.constant 0 : index
    %3 = vector.load %arg3[%c0_3, %c0_4] : memref<1x128xf32, #tpu.memory_space<vmem>>, vector<1x128xf32>
    %4 = vector.broadcast %3 : vector<1x128xf32> to vector<8x128xf32>
    %5 = arith.addf %2, %4 : vector<8x128xf32>
    %cst_5 = arith.constant 0.000000e+00 : f32
    %6 = vector.broadcast %cst_5 : f32 to vector<8x128xf32>
    %7 = arith.maximumf %5, %6 : vector<8x128xf32>
    %c0_6 = arith.constant 0 : index
    %c0_7 = arith.constant 0 : index
    %8 = vector.load %arg4[%c0_6, %c0_7] : memref<128x64xf32, #tpu.memory_space<vmem>>, vector<128x64xf32>
    %cst_8 = arith.constant dense<0.000000e+00> : vector<8x64xf32>
    %9 = tpu.matmul %7, %8, %cst_8 {dimension_numbers = #tpu.dot_dimension_numbers<[1], [0], [0], [1], [0, 0, 1, 1], [], []>} : vector<8x128xf32>, vector<128x64xf32>, vector<8x64xf32> -> vector<8x64xf32>
    %c0_9 = arith.constant 0 : index
    %c0_10 = arith.constant 0 : index
    %10 = vector.load %arg5[%c0_9, %c0_10] : memref<1x64xf32, #tpu.memory_space<vmem>>, vector<1x64xf32>
    %11 = vector.broadcast %10 : vector<1x64xf32> to vector<8x64xf32>
    %12 = arith.addf %9, %11 : vector<8x64xf32>
    %cst_11 = arith.constant 0.000000e+00 : f32
    %13 = vector.broadcast %cst_11 : f32 to vector<8x64xf32>
    %14 = arith.maximumf %12, %13 : vector<8x64xf32>
    %c0_12 = arith.constant 0 : index
    %c0_13 = arith.constant 0 : index
    %15 = vector.load %arg6[%c0_12, %c0_13] : memref<64x128xf32, #tpu.memory_space<vmem>>, vector<64x128xf32>
    %cst_14 = arith.constant dense<0.000000e+00> : vector<8x128xf32>
    %16 = tpu.matmul %14, %15, %cst_14 {dimension_numbers = #tpu.dot_dimension_numbers<[1], [0], [0], [1], [0, 0, 1, 1], [], []>} : vector<8x64xf32>, vector<64x128xf32>, vector<8x128xf32> -> vector<8x128xf32>
    %c0_15 = arith.constant 0 : index
    %c0_16 = arith.constant 0 : index
    %17 = vector.load %arg7[%c0_15, %c0_16] : memref<1x128xf32, #tpu.memory_space<vmem>>, vector<1x128xf32>
    %18 = vector.broadcast %17 : vector<1x128xf32> to vector<8x128xf32>
    %19 = arith.addf %16, %18 : vector<8x128xf32>
    %c0_17 = arith.constant 0 : index
    %c0_18 = arith.constant 0 : index
    %20 = vector.load %arg8[%c0_17, %c0_18] : memref<8x128xf32, #tpu.memory_space<vmem>>, vector<8x128xf32>
    tpu.vector_store %arg8[%c0_17, %c0_18], %19 {strides = array<i32>} : memref<8x128xf32, #tpu.memory_space<vmem>>, vector<8x128xf32>,
    return
  }
  func.func @transform_0(%arg0: i32) -> (i32, i32) {
    %c0_i32 = arith.constant 0 : i32
    %c0_i32_0 = arith.constant 0 : i32
    return %arg0, %c0_i32 : i32, i32
  }
  func.func @transform_1(%arg0: i32) -> (i32, i32) {
    %c0_i32 = arith.constant 0 : i32
    %c0_i32_0 = arith.constant 0 : i32
    %c0_i32_1 = arith.constant 0 : i32
    return %c0_i32, %c0_i32_0 : i32, i32
  }
  func.func @transform_2(%arg0: i32) -> (i32, i32) {
    %c0_i32 = arith.constant 0 : i32
    %c0_i32_0 = arith.constant 0 : i32
    %c0_i32_1 = arith.constant 0 : i32
    return %c0_i32, %c0_i32_0 : i32, i32
  }
  func.func @transform_3(%arg0: i32) -> (i32, i32) {
    %c0_i32 = arith.constant 0 : i32
    %c0_i32_0 = arith.constant 0 : i32
    %c0_i32_1 = arith.constant 0 : i32
    return %c0_i32, %c0_i32_0 : i32, i32
  }
  func.func @transform_4(%arg0: i32) -> (i32, i32) {
    %c0_i32 = arith.constant 0 : i32
    %c0_i32_0 = arith.constant 0 : i32
    %c0_i32_1 = arith.constant 0 : i32
    return %c0_i32, %c0_i32_0 : i32, i32
  }
  func.func @transform_5(%arg0: i32) -> (i32, i32) {
    %c0_i32 = arith.constant 0 : i32
    %c0_i32_0 = arith.constant 0 : i32
    %c0_i32_1 = arith.constant 0 : i32
    return %c0_i32, %c0_i32_0 : i32, i32
  }
  func.func @transform_6(%arg0: i32) -> (i32, i32) {
    %c0_i32 = arith.constant 0 : i32
    %c0_i32_0 = arith.constant 0 : i32
    %c0_i32_1 = arith.constant 0 : i32
    return %c0_i32, %c0_i32_0 : i32, i32
  }
  func.func @transform_7(%arg0: i32) -> (i32, i32) {
    %c0_i32 = arith.constant 0 : i32
    %c0_i32_0 = arith.constant 0 : i32
    return %arg0, %c0_i32 : i32, i32
  }
}

module attributes {stable_mosaic.version = 11 : i64} {
  func.func @mlp_kernel(%arg0: i32, %arg1: memref<8x784xf32, #tpu.memory_space<vmem>>, %arg2: memref<784x128xf32, #tpu.memory_space<vmem>>, %arg3: memref<1x128xf32, #tpu.memory_space<vmem>>, %arg4: memref<128x64xf32, #tpu.memory_space<vmem>>, %arg5: memref<1x64xf32, #tpu.memory_space<vmem>>, %arg6: memref<64x128xf32, #tpu.memory_space<vmem>>, %arg7: memref<1x128xf32, #tpu.memory_space<vmem>>, %arg8: memref<8x128xf32, #tpu.memory_space<vmem>>) attributes {dimension_semantics = [#tpu.dimension_semantics<parallel>], iteration_bounds = array<i64: 1>, scalar_prefetch = 0 : i64, scratch_operands = 0 : i64, tpu.core_type = #tpu.core_type<tc>, window_params = [{transform_indices = @transform_0, window_bounds = array<i64: 8, 784>}, {pipeline_mode = #tpu.pipeline_mode<synchronous>, transform_indices = @transform_1, window_bounds = array<i64: 784, 128>}, {pipeline_mode = #tpu.pipeline_mode<synchronous>, transform_indices = @transform_2, window_bounds = array<i64: 1, 128>}, {pipeline_mode = #tpu.pipeline_mode<synchronous>, transform_indices = @transform_3, window_bounds = array<i64: 128, 64>}, {pipeline_mode = #tpu.pipeline_mode<synchronous>, transform_indices = @transform_4, window_bounds = array<i64: 1, 64>}, {pipeline_mode = #tpu.pipeline_mode<synchronous>, transform_indices = @transform_5, window_bounds = array<i64: 64, 128>}, {pipeline_mode = #tpu.pipeline_mode<synchronous>, transform_indices = @transform_6, window_bounds = array<i64: 1, 128>}, {transform_indices = @transform_7, window_bounds = array<i64: 8, 128>}]} {
    %c0 = arith.constant 0 : index
    %c0_0 = arith.constant 0 : index
    %0 = vector.load %arg1[%c0, %c0_0] : memref<8x784xf32, #tpu.memory_space<vmem>>, vector<8x784xf32>
    %c0_1 = arith.constant 0 : index
    %c0_2 = arith.constant 0 : index
    %1 = vector.load %arg2[%c0_1, %c0_2] : memref<784x128xf32, #tpu.memory_space<vmem>>, vector<784x128xf32>
    %cst = arith.constant dense<0.000000e+00> : vector<8x128xf32>
    %2 = tpu.matmul %0, %1, %cst {dimension_numbers = #tpu.dot_dimension_numbers<[1], [0], [0], [1], [0, 0, 1, 1], [], []>} : vector<8x784xf32>, vector<784x128xf32>, vector<8x128xf32> -> vector<8x128xf32>
    %c0_3 = arith.constant 0 : index
    %c0_4 = arith.constant 0 : index
    %3 = vector.load %arg3[%c0_3, %c0_4] : memref<1x128xf32, #tpu.memory_space<vmem>>, vector<1x128xf32>
    %4 = vector.broadcast %3 : vector<1x128xf32> to vector<8x128xf32>
    %5 = arith.addf %2, %4 : vector<8x128xf32>
    %cst_5 = arith.constant 0.000000e+00 : f32
    %6 = vector.broadcast %cst_5 : f32 to vector<8x128xf32>
    %7 = arith.maximumf %5, %6 : vector<8x128xf32>
    %c0_6 = arith.constant 0 : index
    %c0_7 = arith.constant 0 : index
    %8 = vector.load %arg4[%c0_6, %c0_7] : memref<128x64xf32, #tpu.memory_space<vmem>>, vector<128x64xf32>
    %cst_8 = arith.constant dense<0.000000e+00> : vector<8x64xf32>
    %9 = tpu.matmul %7, %8, %cst_8 {dimension_numbers = #tpu.dot_dimension_numbers<[1], [0], [0], [1], [0, 0, 1, 1], [], []>} : vector<8x128xf32>, vector<128x64xf32>, vector<8x64xf32> -> vector<8x64xf32>
    %c0_9 = arith.constant 0 : index
    %c0_10 = arith.constant 0 : index
    %10 = vector.load %arg5[%c0_9, %c0_10] : memref<1x64xf32, #tpu.memory_space<vmem>>, vector<1x64xf32>
    %11 = vector.broadcast %10 : vector<1x64xf32> to vector<8x64xf32>
    %12 = arith.addf %9, %11 : vector<8x64xf32>
    %cst_11 = arith.constant 0.000000e+00 : f32
    %13 = vector.broadcast %cst_11 : f32 to vector<8x64xf32>
    %14 = arith.maximumf %12, %13 : vector<8x64xf32>
    %c0_12 = arith.constant 0 : index
    %c0_13 = arith.constant 0 : index
    %15 = vector.load %arg6[%c0_12, %c0_13] : memref<64x128xf32, #tpu.memory_space<vmem>>, vector<64x128xf32>
    %cst_14 = arith.constant dense<0.000000e+00> : vector<8x128xf32>
    %16 = tpu.matmul %14, %15, %cst_14 {dimension_numbers = #tpu.dot_dimension_numbers<[1], [0], [0], [1], [0, 0, 1, 1], [], []>} : vector<8x64xf32>, vector<64x128xf32>, vector<8x128xf32> -> vector<8x128xf32>
    %c0_15 = arith.constant 0 : index
    %c0_16 = arith.constant 0 : index
    %17 = vector.load %arg7[%c0_15, %c0_16] : memref<1x128xf32, #tpu.memory_space<vmem>>, vector<1x128xf32>
    %18 = vector.broadcast %17 : vector<1x128xf32> to vector<8x128xf32>
    %19 = arith.addf %16, %18 : vector<8x128xf32>
    %c0_17 = arith.constant 0 : index
    %c0_18 = arith.constant 0 : index
    %20 = vector.load %arg8[%c0_17, %c0_18] : memref<8x128xf32, #tpu.memory_space<vmem>>, vector<8x128xf32>
    tpu.vector_store %arg8[%c0_17, %c0_18], %19 {strides = array<i32>} : memref<8x128xf32, #tpu.memory_space<vmem>>, vector<8x128xf32>,
    return
  }
  func.func @transform_0(%arg0: i32) -> (i32, i32) {
    %c0_i32 = arith.constant 0 : i32
    %c0_i32_0 = arith.constant 0 : i32
    return %arg0, %c0_i32 : i32, i32
  }
  func.func @transform_1(%arg0: i32) -> (i32, i32) {
    %c0_i32 = arith.constant 0 : i32
    %c0_i32_0 = arith.constant 0 : i32
    %c0_i32_1 = arith.constant 0 : i32
    return %c0_i32, %c0_i32_0 : i32, i32
  }
  func.func @transform_2(%arg0: i32) -> (i32, i32) {
    %c0_i32 = arith.constant 0 : i32
    %c0_i32_0 = arith.constant 0 : i32
    %c0_i32_1 = arith.constant 0 : i32
    return %c0_i32, %c0_i32_0 : i32, i32
  }
  func.func @transform_3(%arg0: i32) -> (i32, i32) {
    %c0_i32 = arith.constant 0 : i32
    %c0_i32_0 = arith.constant 0 : i32
    %c0_i32_1 = arith.constant 0 : i32
    return %c0_i32, %c0_i32_0 : i32, i32
  }
  func.func @transform_4(%arg0: i32) -> (i32, i32) {
    %c0_i32 = arith.constant 0 : i32
    %c0_i32_0 = arith.constant 0 : i32
    %c0_i32_1 = arith.constant 0 : i32
    return %c0_i32, %c0_i32_0 : i32, i32
  }
  func.func @transform_5(%arg0: i32) -> (i32, i32) {
    %c0_i32 = arith.constant 0 : i32
    %c0_i32_0 = arith.constant 0 : i32
    %c0_i32_1 = arith.constant 0 : i32
    return %c0_i32, %c0_i32_0 : i32, i32
  }
  func.func @transform_6(%arg0: i32) -> (i32, i32) {
    %c0_i32 = arith.constant 0 : i32
    %c0_i32_0 = arith.constant 0 : i32
    %c0_i32_1 = arith.constant 0 : i32
    return %c0_i32, %c0_i32_0 : i32, i32
  }
  func.func @transform_7(%arg0: i32) -> (i32, i32) {
    %c0_i32 = arith.constant 0 : i32
    %c0_i32_0 = arith.constant 0 : i32
    return %arg0, %c0_i32 : i32, i32
  }
}

</mosaic_0001>

<bundles_post_ra>
// kernel: tpu_custom_call.1
= control target key start
LH: loop header
LB: loop body
LE: loop exit
PB: predicated region body
PF: predicated region fallthrough
CT: control target
= control target key end

     0   :  { %12 = vsyncpa [#allocation3], 0  ;;  %s1216_s0 = inlined_call_operand.vmem [shape: f32[8,784], index: 0, kind: input, shape index: {}]   ;;  %s1217_s1 = inlined_call_operand.hbm [shape: f32[784,128], index: 1, kind: input, shape index: {}]   ;;  %s1218_s2 = inlined_call_operand.vmem [shape: f32[1,128], index: 2, kind: input, shape index: {}]   ;;  %s1219_s3 = inlined_call_operand.vmem [shape: f32[128,64], index: 3, kind: input, shape index: {}]   ;;  %s1220_s4 = inlined_call_operand.vmem [shape: f32[1,64], index: 4, kind: input, shape index: {}]   ;;  %s1221_s5 = inlined_call_operand.vmem [shape: f32[64,128], index: 5, kind: input, shape index: {}]   ;;  %s1222_s6 = inlined_call_operand.vmem [shape: f32[1,128], index: 6, kind: input, shape index: {}]   ;;  %s1223_s7 = inlined_call_operand.hbm [shape: f32[8,128], index: 7, kind: output, shape index: {}]  }
   0x1   :  { %13 = vsyncpa [#allocation4], 0  ;;  %s1027_s24 = smov [#allocation2]   ;;  %s979_s28 = scalar_lea.hbm %s1217_s1, 12544 }
   0x2   :  { %s21_s25 = sshll.u32 %s1027_s24, 4  ;;  %p980_p0 = scmp.ne.s32.totalorder %s1217_s1, %s979_s28  ;;  %s22_s25 = int_to_ptr.vmem [resolvable:$true] %s21_s25 }
   0x3   :  { %p983_p1 = scmp.lt.u32.totalorder %s979_s28, %s1217_s1 }
   0x5   :  { %p985_p2 = pnand %p983_p1, %p980_p0 }
   0x7   :  { %988 = shalt.err (!%p985_p2)
}
   0x8   :  { %s989_s10 = scalar_lea.vmem %s22_s25, 12544  ;;  %p994_p4 = scmp.lt.s32.totalorder %s22_s25, %s22_s25 }
   0x9   :  { %p990_p3 = scmp.ne.s32.totalorder %s22_s25, %s989_s10  ;;  %p995_p5 = scmp.lt.s32.totalorder %s989_s10, %s989_s10 }
   0xb   :  { %p996_p6 = por %p995_p5, %p994_p4 }
   0xd   :  { %p997_p7 = pnand %p996_p6, %p990_p3 }
   0xf   :  { %1000 = shalt.err (!%p997_p7)
}
  0x10   :  { %s1028_s11 = smov 128   ;;  %s1029_s12 = smov 8  }
  0x11   :  { %27 = dma.hbm_to_vmem [thread:$0]  %s1217_s1, 12544, %s22_s25, [#allocation3], %s1028_s11, %s1028_s11, %s1029_s12  }
  0x12   :  { %1023 = dma.done.wait [#allocation3], 12544  }
  0x13   :  { %1024 = vsyncadd [#allocation3], 4294954752  ;;  %v64_v0 = vld [vmem:[#allocation2 + $0x80] sm:$0xff]  ;;  %v65_v1 = vld [vmem:[#allocation2 + $0x88] sm:$0xff]  ;;  %vm1031_vm0 = vmmov 0   ;;  %vm153_vm1 = vcmask 130048  }
  0x14   :  { %v48_v2 = vld [vmem:[#allocation2] sm:$0xff]  ;;  %v837_v3 = vpack.c.bf16 %v65_v1, %v64_v0  ;;  %v49_v4 = vld [vmem:[#allocation2 + $0x8] sm:$0xff]  ;;  %v66_v11 = vld [vmem:[#allocation2 + $0x90] sm:$0xff]  ;;  %vm547_vm2 = vcmask 523264   ;;  %s1033_s30 = smov [#allocation5]  }
  0x15   :  { %v96_v5 = vld [vmem:[#allocation2 + $0x180] sm:$0xff]  ;;  %v97_v6 = vld [vmem:[#allocation2 + $0x188] sm:$0xff]  ;;  %v839_v7 = vpack.c.bf16 %v49_v4, %v48_v2  ;;  %v67_v13 = vld [vmem:[#allocation2 + $0x98] sm:$0xff]  ;;  %s628_s8 = sshll.u32 %s1033_s30, 4  ;;  %s629_s8 = int_to_ptr.vmem [resolvable:$true] %s628_s8 }
  0x16   :  { %v869_v8 = vpack.c.bf16 %v97_v6, %v96_v5  ;;  %v80_v9 = vld [vmem:[#allocation2 + $0x100] sm:$0xff]  ;;  %v81_v10 = vld [vmem:[#allocation2 + $0x108] sm:$0xff]  ;;  %838 = vmatprep.subr.bf16.mxu0 %v837_v3  ;;  %v50_v14 = vld [vmem:[#allocation2 + $0x10] sm:$0xff]  ;;  %v841_v16 = vpack.c.bf16 %v67_v13, %v66_v11  ;;  %p1006_p9 = scmp.lt.s32.totalorder %s629_s8, %s629_s8 }
  0x17   :  { %v871_v12 = vpack.c.bf16 %v81_v10, %v80_v9  ;;  %v51_v15 = vld [vmem:[#allocation2 + $0x18] sm:$0xff]  ;;  %840 = vmatpush3.bf16.msra.mxu0 %v839_v7  ;;  %v98_v18 = vld [vmem:[#allocation2 + $0x190] sm:$0xff]  ;;  %v68_v23 = vld [vmem:[#allocation2 + $0xa0] sm:$0xff] }
  0x18   :  { %870 = vmatprep.subr.bf16.mxu1 %v869_v8  ;;  %v843_v17 = vpack.c.bf16 %v51_v15, %v50_v14  ;;  %v99_v19 = vld [vmem:[#allocation2 + $0x198] sm:$0xff]  ;;  %v82_v20 = vld [vmem:[#allocation2 + $0x110] sm:$0xff]  ;;  %v69_v24 = vld [vmem:[#allocation2 + $0xa8] sm:$0xff]  ;;  %842 = vmatprep.subr.bf16.mxu0 %v841_v16 }
  0x19   :  { %872 = vmatpush3.bf16.msra.mxu1 %v871_v12  ;;  %v873_v21 = vpack.c.bf16 %v99_v19, %v98_v18  ;;  %v83_v22 = vld [vmem:[#allocation2 + $0x118] sm:$0xff]  ;;  %v845_v26 = vpack.c.bf16 %v69_v24, %v68_v23  ;;  %v52_v27 = vld [vmem:[#allocation2 + $0x20] sm:$0xff]  ;;  %v53_v28 = vld [vmem:[#allocation2 + $0x28] sm:$0xff] }
  0x1a   :  { %v875_v25 = vpack.c.bf16 %v83_v22, %v82_v20  ;;  %v100_v29 = vld [vmem:[#allocation2 + $0x1a0] sm:$0xff]  ;;  %v101_v30 = vld [vmem:[#allocation2 + $0x1a8] sm:$0xff]  ;;  %v847_v33 = vpack.c.bf16 %v53_v28, %v52_v27  ;;  %v70_v35 = vld [vmem:[#allocation2 + $0xb0] sm:$0xff] }
  0x1b   :  { %874 = vmatprep.subr.bf16.mxu1 %v873_v21  ;;  %v84_v31 = vld [vmem:[#allocation2 + $0x120] sm:$0xff]  ;;  %v85_v32 = vld [vmem:[#allocation2 + $0x128] sm:$0xff]  ;;  %844 = vmatpush3.bf16.msra.mxu0 %v843_v17  ;;  %v877_v34 = vpack.c.bf16 %v101_v30, %v100_v29  ;;  %v71_v36 = vld [vmem:[#allocation2 + $0xb8] sm:$0xff] }
  0x1c   :  { %v54_v37 = vld [vmem:[#allocation2 + $0x30] sm:$0xff]  ;;  %846 = vmatprep.subr.bf16.mxu0 %v845_v26  ;;  %v879_v38 = vpack.c.bf16 %v85_v32, %v84_v31  ;;  %v849_v39 = vpack.c.bf16 %v71_v36, %v70_v35  ;;  %v55_v40 = vld [vmem:[#allocation2 + $0x38] sm:$0xff]  ;;  %v72_v46 = vld [vmem:[#allocation2 + $0xc0] sm:$0xff] }
  0x1d   :  { %876 = vmatpush3.bf16.msra.mxu1 %v875_v25  ;;  %v102_v41 = vld [vmem:[#allocation2 + $0x1b0] sm:$0xff]  ;;  %v103_v42 = vld [vmem:[#allocation2 + $0x1b8] sm:$0xff]  ;;  %v73_v47 = vld [vmem:[#allocation2 + $0xc8] sm:$0xff]  ;;  %v851_v48 = vpack.c.bf16 %v55_v40, %v54_v37 }
  0x1e   :  { %878 = vmatprep.subr.bf16.mxu1 %v877_v34  ;;  %v881_v43 = vpack.c.bf16 %v103_v42, %v102_v41  ;;  %v86_v44 = vld [vmem:[#allocation2 + $0x130] sm:$0xff]  ;;  %v87_v45 = vld [vmem:[#allocation2 + $0x138] sm:$0xff]  ;;  %v104_v49 = vld [vmem:[#allocation2 + $0x1c0] sm:$0xff]  ;;  %v853_v52 = vpack.c.bf16 %v73_v47, %v72_v46 }
  0x1f   :  { %848 = vmatpush3.bf16.msra.mxu0 %v847_v33  ;;  %v105_v50 = vld [vmem:[#allocation2 + $0x1c8] sm:$0xff]  ;;  %v883_v51 = vpack.c.bf16 %v87_v45, %v86_v44  ;;  %v56_v53 = vld [vmem:[#allocation2 + $0x40] sm:$0xff]  ;;  %v74_v58 = vld [vmem:[#allocation2 + $0xd0] sm:$0xff] }
  0x20   :  { %850 = vmatprep.subr.bf16.mxu0 %v849_v39  ;;  %v57_v54 = vld [vmem:[#allocation2 + $0x48] sm:$0xff]  ;;  %v88_v55 = vld [vmem:[#allocation2 + $0x140] sm:$0xff]  ;;  %v885_v56 = vpack.c.bf16 %v105_v50, %v104_v49  ;;  %v75_v59 = vld [vmem:[#allocation2 + $0xd8] sm:$0xff]  ;;  %v1030_v50 = vmov 0.0|0.0  }
  0x21   :  { %880 = vmatpush3.bf16.msra.mxu1 %v879_v38  ;;  %v89_v57 = vld [vmem:[#allocation2 + $0x148] sm:$0xff]  ;;  %v106_v60 = vld [vmem:[#allocation2 + $0x1d0] sm:$0xff]  ;;  %v107_v61 = vld [vmem:[#allocation2 + $0x1d8] sm:$0xff]  ;;  %v855_v62 = vpack.c.bf16 %v57_v54, %v56_v53  ;;  %v857_v0 = vpack.c.bf16 %v75_v59, %v74_v58 }
  0x22   :  { %882 = vmatprep.subr.bf16.mxu1 %v881_v43  ;;  %v887_v63 = vpack.c.bf16 %v89_v57, %v88_v55  ;;  %v58_v1 = vld [vmem:[#allocation2 + $0x50] sm:$0xff]  ;;  %v59_v2 = vld [vmem:[#allocation2 + $0x58] sm:$0xff]  ;;  %v889_v4 = vpack.c.bf16 %v107_v61, %v106_v60  ;;  %v76_v6 = vld [vmem:[#allocation2 + $0xe0] sm:$0xff]  ;;  %v1032_v60 = vmov 0.0  }
  0x23   :  { %852 = vmatpush3.bf16.msra.mxu0 %v851_v48  ;;  %v90_v3 = vld [vmem:[#allocation2 + $0x150] sm:$0xff]  ;;  %v91_v5 = vld [vmem:[#allocation2 + $0x158] sm:$0xff]  ;;  %v77_v7 = vld [vmem:[#allocation2 + $0xe8] sm:$0xff]  ;;  %v859_v10 = vpack.c.bf16 %v59_v2, %v58_v1 }
  0x24   :  { %854 = vmatprep.subr.bf16.mxu0 %v853_v52  ;;  %v108_v8 = vld [vmem:[#allocation2 + $0x1e0] sm:$0xff]  ;;  %v109_v9 = vld [vmem:[#allocation2 + $0x1e8] sm:$0xff]  ;;  %v891_v13 = vpack.c.bf16 %v91_v5, %v90_v3  ;;  %v861_v14 = vpack.c.bf16 %v77_v7, %v76_v6  ;;  %v78_v19 = vld [vmem:[#allocation2 + $0xf0] sm:$0xff] }
  0x25   :  { %884 = vmatpush3.bf16.msra.mxu1 %v883_v51  ;;  %v60_v11 = vld [vmem:[#allocation2 + $0x60] sm:$0xff]  ;;  %v42_v12 = vld [vmem:[%s1216_s0 + $0x8] sm:$0xff]  ;;  %v893_v18 = vpack.c.bf16 %v109_v9, %v108_v8  ;;  %v79_v20 = vld [vmem:[#allocation2 + $0xf8] sm:$0xff] }
  0x26   :  { %886 = vmatprep.subr.bf16.mxu1 %v885_v56  ;;  %v61_v15 = vld [vmem:[#allocation2 + $0x68] sm:$0xff]  ;;  %v92_v16 = vld [vmem:[#allocation2 + $0x160] sm:$0xff]  ;;  %221 = vmatprep.mubr.f32.mxu0 %v42_v12  ;;  %v44_v21 = vld [vmem:[%s1216_s0 + $0x18] sm:$0xff]  ;;  %v865_v26 = vpack.c.bf16 %v79_v20, %v78_v19 }
  0x27   :  { %856 = vmatpush3.bf16.msra.mxu0 %v855_v62  ;;  %v93_v17 = vld [vmem:[#allocation2 + $0x168] sm:$0xff]  ;;  %v110_v22 = vld [vmem:[#allocation2 + $0x1f0] sm:$0xff]  ;;  %v111_v23 = vld [vmem:[#allocation2 + $0x1f8] sm:$0xff]  ;;  %291 = vmatprep.mubr.f32.mxu1 %v44_v21  ;;  %v863_v24 = vpack.c.bf16 %v61_v15, %v60_v11 }
  0x28   :  { %858 = vmatprep.subr.bf16.mxu0 %v857_v0  ;;  %v895_v25 = vpack.c.bf16 %v93_v17, %v92_v16  ;;  %v62_v27 = vld [vmem:[#allocation2 + $0x70] sm:$0xff]  ;;  %v63_v28 = vld [vmem:[#allocation2 + $0x78] sm:$0xff]  ;;  %v897_v30 = vpack.c.bf16 %v111_v23, %v110_v22  ;;  %v128_v32 = vld [vmem:[#allocation2 + $0x280] sm:$0xff] }
  0x29   :  { %888 = vmatpush3.bf16.msra.mxu1 %v887_v63  ;;  %v94_v29 = vld [vmem:[#allocation2 + $0x170] sm:$0xff]  ;;  %v95_v31 = vld [vmem:[#allocation2 + $0x178] sm:$0xff]  ;;  %v129_v33 = vld [vmem:[#allocation2 + $0x288] sm:$0xff]  ;;  %v867_v34 = vpack.c.bf16 %v63_v28, %v62_v27 }
  0x2a   :  { %890 = vmatprep.subr.bf16.mxu1 %v889_v4  ;;  %v899_v35 = vpack.c.bf16 %v95_v31, %v94_v29  ;;  %v901_v36 = vpack.c.bf16 %v129_v33, %v128_v32  ;;  %v112_v37 = vld [vmem:[#allocation2 + $0x200] sm:$0xff]  ;;  %v113_v38 = vld [vmem:[#allocation2 + $0x208] sm:$0xff]  ;;  %v130_v39 = vld [vmem:[#allocation2 + $0x290] sm:$0xff] }
  0x2b   :  { %860 = vmatpush3.bf16.msra.mxu0 %v859_v10  ;;  %v131_v40 = vld [vmem:[#allocation2 + $0x298] sm:$0xff]  ;;  %v41_v41 = vld [vmem:[%s1216_s0] sm:$0xff]  ;;  %v903_v42 = vpack.c.bf16 %v113_v38, %v112_v37  ;;  %v43_v43 = vld [vmem:[%s1216_s0 + $0x10] sm:$0xff] }
  0x2c   :  { %862 = vmatprep.subr.bf16.mxu0 %v861_v14  ;;  %v114_v44 = vld [vmem:[#allocation2 + $0x210] sm:$0xff]  ;;  %v905_v45 = vpack.c.bf16 %v131_v40, %v130_v39  ;;  %v115_v46 = vld [vmem:[#allocation2 + $0x218] sm:$0xff]  ;;  %v132_v47 = vld [vmem:[#allocation2 + $0x2a0] sm:$0xff] }
  0x2d   :  { %892 = vmatpush3.bf16.msra.mxu1 %v891_v13  ;;  %v133_v48 = vld [vmem:[#allocation2 + $0x2a8] sm:$0xff]  ;;  %v144_v51 = vld [vmem:[#allocation2 + $0x300] sm:$0xff]  ;;  %v907_v54 = vpack.c.bf16 %v115_v46, %v114_v44  ;;  %v134_v58 = vld [vmem:[#allocation2 + $0x2b0] sm:$0xff] }
  0x2e   :  { %894 = vmatprep.subr.bf16.mxu1 %v893_v18  ;;  %v46_v49 = vld [vmem:[%s1216_s0 + $0x28] sm:$0xff]  ;;  %v909_v55 = vpack.c.bf16 %v133_v48, %v132_v47  ;;  %v116_v56 = vld [vmem:[#allocation2 + $0x220] sm:$0xff]  ;;  %v135_v59 = vld [vmem:[#allocation2 + $0x2b8] sm:$0xff] }
  0x2f   :  { %864 = vmatpush3.bf16.msra.mxu0 %v863_v24  ;;  %v145_v52 = vld [vmem:[#allocation2 + $0x308] sm:$0xff]  ;;  %v47_v61 = vld [vmem:[%s1216_s0 + $0x30] sm:$0xff]  ;;  %v913_v63 = vpack.c.bf16 %v135_v59, %v134_v58  ;;  %v119_v1 = vld [vmem:[#allocation2 + $0x238] sm:$0xff] }
  0x30   :  { %866 = vmatprep.subr.bf16.mxu0 %v865_v26  ;;  %v934_v53 = vpack.c.bf16 %v145_v52, %v144_v51  ;;  %v117_v57 = vld [vmem:[#allocation2 + $0x228] sm:$0xff]  ;;  %v118_v0 = vld [vmem:[#allocation2 + $0x230] sm:$0xff]  ;;  %v136_v2 = vld [vmem:[#allocation2 + $0x2c0] sm:$0xff] }
  0x31   :  { %896 = vmatpush3.bf16.msra.mxu1 %v895_v25  ;;  %v911_v62 = vpack.c.bf16 %v117_v57, %v116_v56  ;;  %v137_v3 = vld [vmem:[#allocation2 + $0x2c8] sm:$0xff]  ;;  %v915_v4 = vpack.c.bf16 %v119_v1, %v118_v0  ;;  %v120_v6 = vld [vmem:[#allocation2 + $0x240] sm:$0xff]  ;;  %v138_v8 = vld [vmem:[#allocation2 + $0x2d0] sm:$0xff] }
  0x32   :  { %898 = vmatprep.subr.bf16.mxu1 %v897_v30  ;;  %v917_v5 = vpack.c.bf16 %v137_v3, %v136_v2  ;;  %v121_v7 = vld [vmem:[#allocation2 + $0x248] sm:$0xff]  ;;  %v139_v9 = vld [vmem:[#allocation2 + $0x2d8] sm:$0xff]  ;;  %v122_v12 = vld [vmem:[#allocation2 + $0x250] sm:$0xff] }
  0x33   :  { %868 = vmatpush3.bf16.msra.mxu0 %v867_v34  ;;  %v919_v10 = vpack.c.bf16 %v121_v7, %v120_v6  ;;  %v921_v11 = vpack.c.bf16 %v139_v9, %v138_v8  ;;  %v123_v13 = vld [vmem:[#allocation2 + $0x258] sm:$0xff]  ;;  %v140_v14 = vld [vmem:[#allocation2 + $0x2e0] sm:$0xff]  ;;  %v141_v15 = vld [vmem:[#allocation2 + $0x2e8] sm:$0xff] }
  0x34   :  { %902 = vmatprep.subr.bf16.mxu0 %v901_v36  ;;  %v923_v16 = vpack.c.bf16 %v123_v13, %v122_v12  ;;  %v925_v17 = vpack.c.bf16 %v141_v15, %v140_v14  ;;  %v124_v18 = vld [vmem:[#allocation2 + $0x260] sm:$0xff]  ;;  %v125_v19 = vld [vmem:[#allocation2 + $0x268] sm:$0xff]  ;;  %v142_v20 = vld [vmem:[#allocation2 + $0x2f0] sm:$0xff] }
  0x35   :  { %900 = vmatpush3.bf16.msra.mxu1 %v899_v35  ;;  %v143_v21 = vld [vmem:[#allocation2 + $0x2f8] sm:$0xff]  ;;  %v927_v22 = vpack.c.bf16 %v125_v19, %v124_v18  ;;  %v126_v24 = vld [vmem:[#allocation2 + $0x270] sm:$0xff]  ;;  %v45_v27 = vld [vmem:[%s1216_s0 + $0x20] sm:$0xff] }
  0x36   :  { %933 = vmatprep.subr.bf16.mxu1 %v1030_v50  ;;  %222 = vmatmul.mubr.f32.vlgmr.msra.gmra.mrb[0].mxu0 %v41_v41  ;;  %v929_v23 = vpack.c.bf16 %v143_v21, %v142_v20  ;;  %v127_v25 = vld [vmem:[#allocation2 + $0x278] sm:$0xff]  ;;  %v438_v28 = vld [vmem:[%s1219_s3] sm:$0xff]  ;;  %v439_v29 = vld [vmem:[%s1219_s3 + $0x8] sm:$0xff] }
  0x37   :  { %904 = vmatpush3.bf16.msra.mxu0 %v903_v42  ;;  %361 = vmatprep.mubr.f32.mxu0 %v46_v49  ;;  %v931_v26 = vpack.c.bf16 %v127_v25, %v126_v24  ;;  %v440_v30 = vld [vmem:[%s1219_s3 + $0x10] sm:$0xff]  ;;  %v937_v31 = vpack.c.bf16 %v439_v29, %v438_v28  ;;  %v441_v32 = vld [vmem:[%s1219_s3 + $0x18] sm:$0xff]  ;;  %v442_v34 = vld [vmem:[%s1219_s3 + $0x20] sm:$0xff] }
  0x38   :  { %292 = vmatmul.mubr.f32.vlgmr.msra.gmra.mrb[0].mxu1 %v43_v43  ;;  %906 = vmatprep.subr.bf16.mxu0 %v905_v45  ;;  %v940_v33 = vpack.c.bf16 %v441_v32, %v440_v30  ;;  %v443_v35 = vld [vmem:[%s1219_s3 + $0x28] sm:$0xff]  ;;  %v444_v37 = vld [vmem:[%s1219_s3 + $0x30] sm:$0xff]  ;;  %v445_v38 = vld [vmem:[%s1219_s3 + $0x38] sm:$0xff] }
  0x39   :  { %935 = vmatpush3.bf16.msra.mxu1 %v934_v53  ;;  %780 = vmatprep.mubr.msk.f32.mxu1 %vm1031_vm0, %v1032_v60  ;;  %v943_v36 = vpack.c.bf16 %v443_v35, %v442_v34  ;;  %v946_v39 = vpack.c.bf16 %v445_v38, %v444_v37  ;;  %v446_v40 = vld [vmem:[%s1219_s3 + $0x40] sm:$0xff]  ;;  %v447_v41 = vld [vmem:[%s1219_s3 + $0x48] sm:$0xff]  ;;  %v448_v43 = vld [vmem:[%s1219_s3 + $0x50] sm:$0xff] }
  0x3a   :  { %936 = vmatprep.subr.bf16.mxu1 %v1030_v50  ;;  %v949_v42 = vpack.c.bf16 %v447_v41, %v446_v40  ;;  %v449_v44 = vld [vmem:[%s1219_s3 + $0x58] sm:$0xff]  ;;  %v450_v46 = vld [vmem:[%s1219_s3 + $0x60] sm:$0xff]  ;;  %v451_v47 = vld [vmem:[%s1219_s3 + $0x68] sm:$0xff] }
  0x3b   :  { %908 = vmatpush3.bf16.msra.mxu0 %v907_v54  ;;  %v952_v45 = vpack.c.bf16 %v449_v44, %v448_v43  ;;  %v955_v48 = vpack.c.bf16 %v451_v47, %v450_v46  ;;  %v452_v49 = vld [vmem:[%s1219_s3 + $0x70] sm:$0xff]  ;;  %v453_v51 = vld [vmem:[%s1219_s3 + $0x78] sm:$0xff]  ;;  %v532_v53 = vld [vmem:[%s1221_s5] sm:$0xff] }
  0x3c   :  { %910 = vmatprep.subr.bf16.mxu0 %v909_v55  ;;  %781 = vmatmul.mubr.msk.f32.vlgmr.msra.gmra.mrb[2].mxu1 %vm153_vm1, %v47_v61  ;;  %v958_v52 = vpack.c.bf16 %v453_v51, %v452_v49  ;;  %v533_v54 = vld [vmem:[%s1221_s5 + $0x8] sm:$0xff]  ;;  %v534_v55 = vld [vmem:[%s1221_s5 + $0x10] sm:$0xff]  ;;  %v535_v57 = vld [vmem:[%s1221_s5 + $0x18] sm:$0xff] }
  0x3d   :  { %815 = vmatprep.mubr.msk.f32.mxu1 %vm1031_vm0, %v1032_v60  ;;  %938 = vmatpush3.bf16.msra.mxu1 %v937_v31  ;;  %v961_v56 = vpack.c.bf16 %v533_v54, %v532_v53  ;;  %v964_v58 = vpack.c.bf16 %v535_v57, %v534_v55  ;;  %v536_v59 = vld [vmem:[%s1221_s5 + $0x20] sm:$0xff]  ;;  %v538_v14 = vld [vmem:[%s1221_s5 + $0x30] sm:$0xff]  ;;  %v539_v15 = vld [vmem:[%s1221_s5 + $0x38] sm:$0xff] }
  0x3e   :  { %939 = vmatprep.subr.bf16.mxu1 %v1030_v50 }
  0x3f   :  { %912 = vmatpush3.bf16.msra.mxu0 %v911_v62 }
  0x40   :  { %914 = vmatprep.subr.bf16.mxu0 %v913_v63  ;;  %v637_v63 = vld [vmem:[%s1218_s2] ss:$0 sm:$0xff] }
  0x41   :  { %941 = vmatpush3.bf16.msra.mxu1 %v940_v33 }
  0x42   :  { %942 = vmatprep.subr.bf16.mxu1 %v1030_v50 }
  0x43   :  { %916 = vmatpush3.bf16.msra.mxu0 %v915_v4 }
  0x44   :  { %918 = vmatprep.subr.bf16.mxu0 %v917_v5 }
  0x45   :  { %944 = vmatpush3.bf16.msra.mxu1 %v943_v36 }
  0x46   :  { %945 = vmatprep.subr.bf16.mxu1 %v1030_v50 }
  0x47   :  { %920 = vmatpush3.bf16.msra.mxu0 %v919_v10 }
  0x48   :  { %922 = vmatprep.subr.bf16.mxu0 %v921_v11 }
  0x49   :  { %947 = vmatpush3.bf16.msra.mxu1 %v946_v39 }
  0x4a   :  { %948 = vmatprep.subr.bf16.mxu1 %v1030_v50 }
  0x4b   :  { %924 = vmatpush3.bf16.msra.mxu0 %v923_v16  ;;  %v970_v16 = vpack.c.bf16 %v539_v15, %v538_v14 }
  0x4c   :  { %926 = vmatprep.subr.bf16.mxu0 %v925_v17  ;;  %v639_v17 = vld [vmem:[%s1220_s4] ss:$0 sm:$0xff] }
  0x4d   :  { %950 = vmatpush3.bf16.msra.mxu1 %v949_v42 }
  0x4e   :  { %951 = vmatprep.subr.bf16.mxu1 %v1030_v50 }
  0x4f   :  { %928 = vmatpush3.bf16.msra.mxu0 %v927_v22  ;;  %v640_v22 = vld [vmem:[%s1222_s6] ss:$0 sm:$0xff] }
  0x50   :  { %930 = vmatprep.subr.bf16.mxu0 %v929_v23 }
  0x51   :  { %953 = vmatpush3.bf16.msra.mxu1 %v952_v45 }
  0x52   :  { %954 = vmatprep.subr.bf16.mxu1 %v1030_v50 }
  0x53   :  { %932 = vmatpush3.bf16.msra.mxu0 %v931_v26 }
  0x54   :  { %960 = vmatprep.subr.bf16.mxu0 %v1030_v50 }
  0x55   :  { %956 = vmatpush3.bf16.msra.mxu1 %v955_v48 }
  0x56   :  { %362 = vmatmul.mubr.f32.vlgmr.msra.gmra.mrb[2].mxu0 %v45_v27  ;;  %957 = vmatprep.subr.bf16.mxu1 %v1030_v50 }
  0x57   :  { %834 = vmatprep.mubr.msk.f32.mxu0 %vm1031_vm0, %v1032_v60  ;;  %962 = vmatpush3.bf16.msra.mxu0 %v961_v56  ;;  %v537_v60 = vld [vmem:[%s1221_s5 + $0x28] sm:$0xff]  ;;  %s1001_s5 = scalar_lea.vmem %s629_s8, 128 }
  0x58   :  { %963 = vmatprep.subr.bf16.mxu0 %v1030_v50  ;;  %v967_v61 = vpack.c.bf16 %v537_v60, %v536_v59  ;;  %p1002_p8 = scmp.ne.s32.totalorder %s629_s8, %s1001_s5  ;;  %p1007_p10 = scmp.lt.s32.totalorder %s1001_s5, %s1001_s5 }
  0x59   :  { %959 = vmatpush3.bf16.msra.mxu1 %v958_v52 }
  0x5a   :  { %p1008_p11 = por %p1007_p10, %p1006_p9 }
  0x5b   :  { %965 = vmatpush3.bf16.msra.mxu0 %v964_v58 }
  0x5c   :  { %966 = vmatprep.subr.bf16.mxu0 %v1030_v50  ;;  %p1009_p12 = pnand %p1008_p11, %p1002_p8 }
  0x5f   :  { %968 = vmatpush3.bf16.msra.mxu0 %v967_v61 }
  0x60   :  { %969 = vmatprep.subr.bf16.mxu0 %v1030_v50 }
  0x63   :  { %971 = vmatpush3.bf16.msra.mxu0 %v970_v16 }
 0x109   :  { %v674_v62 = vpop.f32.mrb[0].mxu0 }
 0x10a   :  { %v675_v0 = vpop.f32.mrb[1].mxu0 }
 0x10b   :  { %v709_v1 = vpop.f32.mrb[0].mxu1  ;;  %v676_v2 = vadd.f32 %v675_v0, %v674_v62 }
 0x10c   :  { %v710_v3 = vpop.f32.mrb[1].mxu1 }
 0x10d   :  { %v711_v4 = vadd.f32 %v710_v3, %v709_v1  ;;  %v224_v5 = vadd.f32 %v676_v2, %v637_v63 }
 0x10f   :  { %v294_v6 = vadd.f32 %v711_v4, %v224_v5  ;;  %v433_v7 = vpop.f32.mrb[2].mxu1 }
 0x110   :  { %v782_v8 = vpop.f32.mrb[3].mxu1 }
 0x129   :  { %v744_v9 = vpop.f32.mrb[2].mxu0 }
 0x12a   :  { %v745_v10 = vpop.f32.mrb[3].mxu0 }
 0x12b   :  { %v746_v11 = vadd.f32 %v745_v10, %v744_v9 }
 0x12d   :  { %v364_v12 = vadd.f32 %v746_v11, %v294_v6 }
 0x12f   :  { %v434_v13 = vadd.f32 %v433_v7, %v364_v12 }
 0x131   :  { %v437_v50 = vmax.f32 %v434_v13, 0.0 }
 0x133   :  { %816 = vmatmul.mubr.f32.vlgmr.msra.gmra.mrb[4].mxu1 %v437_v50 }
 0x206   :  { %v527_v18 = vpop.f32.mrb[4].mxu1 }
 0x207   :  { %v528_v19 = vadd.f32 %v639_v17, %v527_v18  ;;  %v817_v20 = vpop.f32.mrb[5].mxu1 }
 0x209   :  { %v531_v21 = vmax.f32 %v528_v19, 0.0 }
 0x20b   :  { %835 = vmatmul.mubr.msk.f32.vlgmr.msra.gmra.mrb[4].mxu0 %vm547_vm2, %v531_v21 }
 0x2de   :  { %v617_v23 = vpop.f32.mrb[4].mxu0 }
 0x2df   :  { %v618_v24 = vadd.f32 %v640_v22, %v617_v23  ;;  %v836_v25 = vpop.f32.mrb[5].mxu0 }
 0x2e1   :  { %621 = vst [vmem:[#allocation5] sm:$0xff] %v618_v24 }
 0x2e2   :  { %1012 = shalt.err (!%p1009_p12)
}
 0x2e3   :  { %s1013_s10 = scalar_lea.hbm %s1223_s7, 128 }
 0x2e4   :  { %p1014_p13 = scmp.ne.s32.totalorder %s1223_s7, %s1013_s10  ;;  %p1017_p0 = scmp.lt.u32.totalorder %s1013_s10, %s1223_s7 }
 0x2e6   :  { %p1019_p1 = pnand %p1017_p0, %p1014_p13 }
 0x2e8   :  { %1022 = shalt.err (!%p1019_p1)
}
 0x2e9   :  { %631 = dma.vmem_to_hbm [thread:$0]  %s629_s8, 128, %s1223_s7, [#allocation4]  }
 0x2ea   :  { %1025 = dma.done.wait [#allocation4], 128  }
 0x2eb   :  { %1026 = vsyncadd [#allocation4], 4294967168 }
 0x2ec   :  { %635 = vsyncpa [#allocation3], 1 }
 0x2ed   :  { %636 = vsyncpa [#allocation4], 1 }

// kernel: tpu_custom_call.1
= control target key start
LH: loop header
LB: loop body
LE: loop exit
PB: predicated region body
PF: predicated region fallthrough
CT: control target
= control target key end

     0   :  { %12 = vsyncpa [#allocation3], 0  ;;  %s1216_s0 = inlined_call_operand.vmem [shape: f32[8,784], index: 0, kind: input, shape index: {}]   ;;  %s1217_s1 = inlined_call_operand.hbm [shape: f32[784,128], index: 1, kind: input, shape index: {}]   ;;  %s1218_s2 = inlined_call_operand.vmem [shape: f32[1,128], index: 2, kind: input, shape index: {}]   ;;  %s1219_s3 = inlined_call_operand.vmem [shape: f32[128,64], index: 3, kind: input, shape index: {}]   ;;  %s1220_s4 = inlined_call_operand.vmem [shape: f32[1,64], index: 4, kind: input, shape index: {}]   ;;  %s1221_s5 = inlined_call_operand.vmem [shape: f32[64,128], index: 5, kind: input, shape index: {}]   ;;  %s1222_s6 = inlined_call_operand.vmem [shape: f32[1,128], index: 6, kind: input, shape index: {}]   ;;  %s1223_s7 = inlined_call_operand.hbm [shape: f32[8,128], index: 7, kind: output, shape index: {}]  }
   0x1   :  { %13 = vsyncpa [#allocation4], 0  ;;  %s1027_s24 = smov [#allocation2]   ;;  %s979_s28 = scalar_lea.hbm %s1217_s1, 12544 }
   0x2   :  { %s21_s25 = sshll.u32 %s1027_s24, 4  ;;  %p980_p0 = scmp.ne.s32.totalorder %s1217_s1, %s979_s28  ;;  %s22_s25 = int_to_ptr.vmem [resolvable:$true] %s21_s25 }
   0x3   :  { %p983_p1 = scmp.lt.u32.totalorder %s979_s28, %s1217_s1 }
   0x5   :  { %p985_p2 = pnand %p983_p1, %p980_p0 }
   0x7   :  { %988 = shalt.err (!%p985_p2)
}
   0x8   :  { %s989_s10 = scalar_lea.vmem %s22_s25, 12544  ;;  %p994_p4 = scmp.lt.s32.totalorder %s22_s25, %s22_s25 }
   0x9   :  { %p990_p3 = scmp.ne.s32.totalorder %s22_s25, %s989_s10  ;;  %p995_p5 = scmp.lt.s32.totalorder %s989_s10, %s989_s10 }
   0xb   :  { %p996_p6 = por %p995_p5, %p994_p4 }
   0xd   :  { %p997_p7 = pnand %p996_p6, %p990_p3 }
   0xf   :  { %1000 = shalt.err (!%p997_p7)
}
  0x10   :  { %s1028_s11 = smov 128   ;;  %s1029_s12 = smov 8  }
  0x11   :  { %27 = dma.hbm_to_vmem [thread:$0]  %s1217_s1, 12544, %s22_s25, [#allocation3], %s1028_s11, %s1028_s11, %s1029_s12  }
  0x12   :  { %1023 = dma.done.wait [#allocation3], 12544  }
  0x13   :  { %1024 = vsyncadd [#allocation3], 4294954752  ;;  %v64_v0 = vld [vmem:[#allocation2 + $0x80] sm:$0xff]  ;;  %v65_v1 = vld [vmem:[#allocation2 + $0x88] sm:$0xff]  ;;  %vm1031_vm0 = vmmov 0   ;;  %vm153_vm1 = vcmask 130048  }
  0x14   :  { %v48_v2 = vld [vmem:[#allocation2] sm:$0xff]  ;;  %v837_v3 = vpack.c.bf16 %v65_v1, %v64_v0  ;;  %v49_v4 = vld [vmem:[#allocation2 + $0x8] sm:$0xff]  ;;  %v66_v11 = vld [vmem:[#allocation2 + $0x90] sm:$0xff]  ;;  %vm547_vm2 = vcmask 523264   ;;  %s1033_s30 = smov [#allocation5]  }
  0x15   :  { %v96_v5 = vld [vmem:[#allocation2 + $0x180] sm:$0xff]  ;;  %v97_v6 = vld [vmem:[#allocation2 + $0x188] sm:$0xff]  ;;  %v839_v7 = vpack.c.bf16 %v49_v4, %v48_v2  ;;  %v67_v13 = vld [vmem:[#allocation2 + $0x98] sm:$0xff]  ;;  %s628_s8 = sshll.u32 %s1033_s30, 4  ;;  %s629_s8 = int_to_ptr.vmem [resolvable:$true] %s628_s8 }
  0x16   :  { %v869_v8 = vpack.c.bf16 %v97_v6, %v96_v5  ;;  %v80_v9 = vld [vmem:[#allocation2 + $0x100] sm:$0xff]  ;;  %v81_v10 = vld [vmem:[#allocation2 + $0x108] sm:$0xff]  ;;  %838 = vmatprep.subr.bf16.mxu0 %v837_v3  ;;  %v50_v14 = vld [vmem:[#allocation2 + $0x10] sm:$0xff]  ;;  %v841_v16 = vpack.c.bf16 %v67_v13, %v66_v11  ;;  %p1006_p9 = scmp.lt.s32.totalorder %s629_s8, %s629_s8 }
  0x17   :  { %v871_v12 = vpack.c.bf16 %v81_v10, %v80_v9  ;;  %v51_v15 = vld [vmem:[#allocation2 + $0x18] sm:$0xff]  ;;  %840 = vmatpush3.bf16.msra.mxu0 %v839_v7  ;;  %v98_v18 = vld [vmem:[#allocation2 + $0x190] sm:$0xff]  ;;  %v68_v23 = vld [vmem:[#allocation2 + $0xa0] sm:$0xff] }
  0x18   :  { %870 = vmatprep.subr.bf16.mxu1 %v869_v8  ;;  %v843_v17 = vpack.c.bf16 %v51_v15, %v50_v14  ;;  %v99_v19 = vld [vmem:[#allocation2 + $0x198] sm:$0xff]  ;;  %v82_v20 = vld [vmem:[#allocation2 + $0x110] sm:$0xff]  ;;  %v69_v24 = vld [vmem:[#allocation2 + $0xa8] sm:$0xff]  ;;  %842 = vmatprep.subr.bf16.mxu0 %v841_v16 }
  0x19   :  { %872 = vmatpush3.bf16.msra.mxu1 %v871_v12  ;;  %v873_v21 = vpack.c.bf16 %v99_v19, %v98_v18  ;;  %v83_v22 = vld [vmem:[#allocation2 + $0x118] sm:$0xff]  ;;  %v845_v26 = vpack.c.bf16 %v69_v24, %v68_v23  ;;  %v52_v27 = vld [vmem:[#allocation2 + $0x20] sm:$0xff]  ;;  %v53_v28 = vld [vmem:[#allocation2 + $0x28] sm:$0xff] }
  0x1a   :  { %v875_v25 = vpack.c.bf16 %v83_v22, %v82_v20  ;;  %v100_v29 = vld [vmem:[#allocation2 + $0x1a0] sm:$0xff]  ;;  %v101_v30 = vld [vmem:[#allocation2 + $0x1a8] sm:$0xff]  ;;  %v847_v33 = vpack.c.bf16 %v53_v28, %v52_v27  ;;  %v70_v35 = vld [vmem:[#allocation2 + $0xb0] sm:$0xff] }
  0x1b   :  { %874 = vmatprep.subr.bf16.mxu1 %v873_v21  ;;  %v84_v31 = vld [vmem:[#allocation2 + $0x120] sm:$0xff]  ;;  %v85_v32 = vld [vmem:[#allocation2 + $0x128] sm:$0xff]  ;;  %844 = vmatpush3.bf16.msra.mxu0 %v843_v17  ;;  %v877_v34 = vpack.c.bf16 %v101_v30, %v100_v29  ;;  %v71_v36 = vld [vmem:[#allocation2 + $0xb8] sm:$0xff] }
  0x1c   :  { %v54_v37 = vld [vmem:[#allocation2 + $0x30] sm:$0xff]  ;;  %846 = vmatprep.subr.bf16.mxu0 %v845_v26  ;;  %v879_v38 = vpack.c.bf16 %v85_v32, %v84_v31  ;;  %v849_v39 = vpack.c.bf16 %v71_v36, %v70_v35  ;;  %v55_v40 = vld [vmem:[#allocation2 + $0x38] sm:$0xff]  ;;  %v72_v46 = vld [vmem:[#allocation2 + $0xc0] sm:$0xff] }
  0x1d   :  { %876 = vmatpush3.bf16.msra.mxu1 %v875_v25  ;;  %v102_v41 = vld [vmem:[#allocation2 + $0x1b0] sm:$0xff]  ;;  %v103_v42 = vld [vmem:[#allocation2 + $0x1b8] sm:$0xff]  ;;  %v73_v47 = vld [vmem:[#allocation2 + $0xc8] sm:$0xff]  ;;  %v851_v48 = vpack.c.bf16 %v55_v40, %v54_v37 }
  0x1e   :  { %878 = vmatprep.subr.bf16.mxu1 %v877_v34  ;;  %v881_v43 = vpack.c.bf16 %v103_v42, %v102_v41  ;;  %v86_v44 = vld [vmem:[#allocation2 + $0x130] sm:$0xff]  ;;  %v87_v45 = vld [vmem:[#allocation2 + $0x138] sm:$0xff]  ;;  %v104_v49 = vld [vmem:[#allocation2 + $0x1c0] sm:$0xff]  ;;  %v853_v52 = vpack.c.bf16 %v73_v47, %v72_v46 }
  0x1f   :  { %848 = vmatpush3.bf16.msra.mxu0 %v847_v33  ;;  %v105_v50 = vld [vmem:[#allocation2 + $0x1c8] sm:$0xff]  ;;  %v883_v51 = vpack.c.bf16 %v87_v45, %v86_v44  ;;  %v56_v53 = vld [vmem:[#allocation2 + $0x40] sm:$0xff]  ;;  %v74_v58 = vld [vmem:[#allocation2 + $0xd0] sm:$0xff] }
  0x20   :  { %850 = vmatprep.subr.bf16.mxu0 %v849_v39  ;;  %v57_v54 = vld [vmem:[#allocation2 + $0x48] sm:$0xff]  ;;  %v88_v55 = vld [vmem:[#allocation2 + $0x140] sm:$0xff]  ;;  %v885_v56 = vpack.c.bf16 %v105_v50, %v104_v49  ;;  %v75_v59 = vld [vmem:[#allocation2 + $0xd8] sm:$0xff]  ;;  %v1030_v50 = vmov 0.0|0.0  }
  0x21   :  { %880 = vmatpush3.bf16.msra.mxu1 %v879_v38  ;;  %v89_v57 = vld [vmem:[#allocation2 + $0x148] sm:$0xff]  ;;  %v106_v60 = vld [vmem:[#allocation2 + $0x1d0] sm:$0xff]  ;;  %v107_v61 = vld [vmem:[#allocation2 + $0x1d8] sm:$0xff]  ;;  %v855_v62 = vpack.c.bf16 %v57_v54, %v56_v53  ;;  %v857_v0 = vpack.c.bf16 %v75_v59, %v74_v58 }
  0x22   :  { %882 = vmatprep.subr.bf16.mxu1 %v881_v43  ;;  %v887_v63 = vpack.c.bf16 %v89_v57, %v88_v55  ;;  %v58_v1 = vld [vmem:[#allocation2 + $0x50] sm:$0xff]  ;;  %v59_v2 = vld [vmem:[#allocation2 + $0x58] sm:$0xff]  ;;  %v889_v4 = vpack.c.bf16 %v107_v61, %v106_v60  ;;  %v76_v6 = vld [vmem:[#allocation2 + $0xe0] sm:$0xff]  ;;  %v1032_v60 = vmov 0.0  }
  0x23   :  { %852 = vmatpush3.bf16.msra.mxu0 %v851_v48  ;;  %v90_v3 = vld [vmem:[#allocation2 + $0x150] sm:$0xff]  ;;  %v91_v5 = vld [vmem:[#allocation2 + $0x158] sm:$0xff]  ;;  %v77_v7 = vld [vmem:[#allocation2 + $0xe8] sm:$0xff]  ;;  %v859_v10 = vpack.c.bf16 %v59_v2, %v58_v1 }
  0x24   :  { %854 = vmatprep.subr.bf16.mxu0 %v853_v52  ;;  %v108_v8 = vld [vmem:[#allocation2 + $0x1e0] sm:$0xff]  ;;  %v109_v9 = vld [vmem:[#allocation2 + $0x1e8] sm:$0xff]  ;;  %v891_v13 = vpack.c.bf16 %v91_v5, %v90_v3  ;;  %v861_v14 = vpack.c.bf16 %v77_v7, %v76_v6  ;;  %v78_v19 = vld [vmem:[#allocation2 + $0xf0] sm:$0xff] }
  0x25   :  { %884 = vmatpush3.bf16.msra.mxu1 %v883_v51  ;;  %v60_v11 = vld [vmem:[#allocation2 + $0x60] sm:$0xff]  ;;  %v42_v12 = vld [vmem:[%s1216_s0 + $0x8] sm:$0xff]  ;;  %v893_v18 = vpack.c.bf16 %v109_v9, %v108_v8  ;;  %v79_v20 = vld [vmem:[#allocation2 + $0xf8] sm:$0xff] }
  0x26   :  { %886 = vmatprep.subr.bf16.mxu1 %v885_v56  ;;  %v61_v15 = vld [vmem:[#allocation2 + $0x68] sm:$0xff]  ;;  %v92_v16 = vld [vmem:[#allocation2 + $0x160] sm:$0xff]  ;;  %221 = vmatprep.mubr.f32.mxu0 %v42_v12  ;;  %v44_v21 = vld [vmem:[%s1216_s0 + $0x18] sm:$0xff]  ;;  %v865_v26 = vpack.c.bf16 %v79_v20, %v78_v19 }
  0x27   :  { %856 = vmatpush3.bf16.msra.mxu0 %v855_v62  ;;  %v93_v17 = vld [vmem:[#allocation2 + $0x168] sm:$0xff]  ;;  %v110_v22 = vld [vmem:[#allocation2 + $0x1f0] sm:$0xff]  ;;  %v111_v23 = vld [vmem:[#allocation2 + $0x1f8] sm:$0xff]  ;;  %291 = vmatprep.mubr.f32.mxu1 %v44_v21  ;;  %v863_v24 = vpack.c.bf16 %v61_v15, %v60_v11 }
  0x28   :  { %858 = vmatprep.subr.bf16.mxu0 %v857_v0  ;;  %v895_v25 = vpack.c.bf16 %v93_v17, %v92_v16  ;;  %v62_v27 = vld [vmem:[#allocation2 + $0x70] sm:$0xff]  ;;  %v63_v28 = vld [vmem:[#allocation2 + $0x78] sm:$0xff]  ;;  %v897_v30 = vpack.c.bf16 %v111_v23, %v110_v22  ;;  %v128_v32 = vld [vmem:[#allocation2 + $0x280] sm:$0xff] }
  0x29   :  { %888 = vmatpush3.bf16.msra.mxu1 %v887_v63  ;;  %v94_v29 = vld [vmem:[#allocation2 + $0x170] sm:$0xff]  ;;  %v95_v31 = vld [vmem:[#allocation2 + $0x178] sm:$0xff]  ;;  %v129_v33 = vld [vmem:[#allocation2 + $0x288] sm:$0xff]  ;;  %v867_v34 = vpack.c.bf16 %v63_v28, %v62_v27 }
  0x2a   :  { %890 = vmatprep.subr.bf16.mxu1 %v889_v4  ;;  %v899_v35 = vpack.c.bf16 %v95_v31, %v94_v29  ;;  %v901_v36 = vpack.c.bf16 %v129_v33, %v128_v32  ;;  %v112_v37 = vld [vmem:[#allocation2 + $0x200] sm:$0xff]  ;;  %v113_v38 = vld [vmem:[#allocation2 + $0x208] sm:$0xff]  ;;  %v130_v39 = vld [vmem:[#allocation2 + $0x290] sm:$0xff] }
  0x2b   :  { %860 = vmatpush3.bf16.msra.mxu0 %v859_v10  ;;  %v131_v40 = vld [vmem:[#allocation2 + $0x298] sm:$0xff]  ;;  %v41_v41 = vld [vmem:[%s1216_s0] sm:$0xff]  ;;  %v903_v42 = vpack.c.bf16 %v113_v38, %v112_v37  ;;  %v43_v43 = vld [vmem:[%s1216_s0 + $0x10] sm:$0xff] }
  0x2c   :  { %862 = vmatprep.subr.bf16.mxu0 %v861_v14  ;;  %v114_v44 = vld [vmem:[#allocation2 + $0x210] sm:$0xff]  ;;  %v905_v45 = vpack.c.bf16 %v131_v40, %v130_v39  ;;  %v115_v46 = vld [vmem:[#allocation2 + $0x218] sm:$0xff]  ;;  %v132_v47 = vld [vmem:[#allocation2 + $0x2a0] sm:$0xff] }
  0x2d   :  { %892 = vmatpush3.bf16.msra.mxu1 %v891_v13  ;;  %v133_v48 = vld [vmem:[#allocation2 + $0x2a8] sm:$0xff]  ;;  %v144_v51 = vld [vmem:[#allocation2 + $0x300] sm:$0xff]  ;;  %v907_v54 = vpack.c.bf16 %v115_v46, %v114_v44  ;;  %v134_v58 = vld [vmem:[#allocation2 + $0x2b0] sm:$0xff] }
  0x2e   :  { %894 = vmatprep.subr.bf16.mxu1 %v893_v18  ;;  %v46_v49 = vld [vmem:[%s1216_s0 + $0x28] sm:$0xff]  ;;  %v909_v55 = vpack.c.bf16 %v133_v48, %v132_v47  ;;  %v116_v56 = vld [vmem:[#allocation2 + $0x220] sm:$0xff]  ;;  %v135_v59 = vld [vmem:[#allocation2 + $0x2b8] sm:$0xff] }
  0x2f   :  { %864 = vmatpush3.bf16.msra.mxu0 %v863_v24  ;;  %v145_v52 = vld [vmem:[#allocation2 + $0x308] sm:$0xff]  ;;  %v47_v61 = vld [vmem:[%s1216_s0 + $0x30] sm:$0xff]  ;;  %v913_v63 = vpack.c.bf16 %v135_v59, %v134_v58  ;;  %v119_v1 = vld [vmem:[#allocation2 + $0x238] sm:$0xff] }
  0x30   :  { %866 = vmatprep.subr.bf16.mxu0 %v865_v26  ;;  %v934_v53 = vpack.c.bf16 %v145_v52, %v144_v51  ;;  %v117_v57 = vld [vmem:[#allocation2 + $0x228] sm:$0xff]  ;;  %v118_v0 = vld [vmem:[#allocation2 + $0x230] sm:$0xff]  ;;  %v136_v2 = vld [vmem:[#allocation2 + $0x2c0] sm:$0xff] }
  0x31   :  { %896 = vmatpush3.bf16.msra.mxu1 %v895_v25  ;;  %v911_v62 = vpack.c.bf16 %v117_v57, %v116_v56  ;;  %v137_v3 = vld [vmem:[#allocation2 + $0x2c8] sm:$0xff]  ;;  %v915_v4 = vpack.c.bf16 %v119_v1, %v118_v0  ;;  %v120_v6 = vld [vmem:[#allocation2 + $0x240] sm:$0xff]  ;;  %v138_v8 = vld [vmem:[#allocation2 + $0x2d0] sm:$0xff] }
  0x32   :  { %898 = vmatprep.subr.bf16.mxu1 %v897_v30  ;;  %v917_v5 = vpack.c.bf16 %v137_v3, %v136_v2  ;;  %v121_v7 = vld [vmem:[#allocation2 + $0x248] sm:$0xff]  ;;  %v139_v9 = vld [vmem:[#allocation2 + $0x2d8] sm:$0xff]  ;;  %v122_v12 = vld [vmem:[#allocation2 + $0x250] sm:$0xff] }
  0x33   :  { %868 = vmatpush3.bf16.msra.mxu0 %v867_v34  ;;  %v919_v10 = vpack.c.bf16 %v121_v7, %v120_v6  ;;  %v921_v11 = vpack.c.bf16 %v139_v9, %v138_v8  ;;  %v123_v13 = vld [vmem:[#allocation2 + $0x258] sm:$0xff]  ;;  %v140_v14 = vld [vmem:[#allocation2 + $0x2e0] sm:$0xff]  ;;  %v141_v15 = vld [vmem:[#allocation2 + $0x2e8] sm:$0xff] }
  0x34   :  { %902 = vmatprep.subr.bf16.mxu0 %v901_v36  ;;  %v923_v16 = vpack.c.bf16 %v123_v13, %v122_v12  ;;  %v925_v17 = vpack.c.bf16 %v141_v15, %v140_v14  ;;  %v124_v18 = vld [vmem:[#allocation2 + $0x260] sm:$0xff]  ;;  %v125_v19 = vld [vmem:[#allocation2 + $0x268] sm:$0xff]  ;;  %v142_v20 = vld [vmem:[#allocation2 + $0x2f0] sm:$0xff] }
  0x35   :  { %900 = vmatpush3.bf16.msra.mxu1 %v899_v35  ;;  %v143_v21 = vld [vmem:[#allocation2 + $0x2f8] sm:$0xff]  ;;  %v927_v22 = vpack.c.bf16 %v125_v19, %v124_v18  ;;  %v126_v24 = vld [vmem:[#allocation2 + $0x270] sm:$0xff]  ;;  %v45_v27 = vld [vmem:[%s1216_s0 + $0x20] sm:$0xff] }
  0x36   :  { %933 = vmatprep.subr.bf16.mxu1 %v1030_v50  ;;  %222 = vmatmul.mubr.f32.vlgmr.msra.gmra.mrb[0].mxu0 %v41_v41  ;;  %v929_v23 = vpack.c.bf16 %v143_v21, %v142_v20  ;;  %v127_v25 = vld [vmem:[#allocation2 + $0x278] sm:$0xff]  ;;  %v438_v28 = vld [vmem:[%s1219_s3] sm:$0xff]  ;;  %v439_v29 = vld [vmem:[%s1219_s3 + $0x8] sm:$0xff] }
  0x37   :  { %904 = vmatpush3.bf16.msra.mxu0 %v903_v42  ;;  %361 = vmatprep.mubr.f32.mxu0 %v46_v49  ;;  %v931_v26 = vpack.c.bf16 %v127_v25, %v126_v24  ;;  %v440_v30 = vld [vmem:[%s1219_s3 + $0x10] sm:$0xff]  ;;  %v937_v31 = vpack.c.bf16 %v439_v29, %v438_v28  ;;  %v441_v32 = vld [vmem:[%s1219_s3 + $0x18] sm:$0xff]  ;;  %v442_v34 = vld [vmem:[%s1219_s3 + $0x20] sm:$0xff] }
  0x38   :  { %292 = vmatmul.mubr.f32.vlgmr.msra.gmra.mrb[0].mxu1 %v43_v43  ;;  %906 = vmatprep.subr.bf16.mxu0 %v905_v45  ;;  %v940_v33 = vpack.c.bf16 %v441_v32, %v440_v30  ;;  %v443_v35 = vld [vmem:[%s1219_s3 + $0x28] sm:$0xff]  ;;  %v444_v37 = vld [vmem:[%s1219_s3 + $0x30] sm:$0xff]  ;;  %v445_v38 = vld [vmem:[%s1219_s3 + $0x38] sm:$0xff] }
  0x39   :  { %935 = vmatpush3.bf16.msra.mxu1 %v934_v53  ;;  %780 = vmatprep.mubr.msk.f32.mxu1 %vm1031_vm0, %v1032_v60  ;;  %v943_v36 = vpack.c.bf16 %v443_v35, %v442_v34  ;;  %v946_v39 = vpack.c.bf16 %v445_v38, %v444_v37  ;;  %v446_v40 = vld [vmem:[%s1219_s3 + $0x40] sm:$0xff]  ;;  %v447_v41 = vld [vmem:[%s1219_s3 + $0x48] sm:$0xff]  ;;  %v448_v43 = vld [vmem:[%s1219_s3 + $0x50] sm:$0xff] }
  0x3a   :  { %936 = vmatprep.subr.bf16.mxu1 %v1030_v50  ;;  %v949_v42 = vpack.c.bf16 %v447_v41, %v446_v40  ;;  %v449_v44 = vld [vmem:[%s1219_s3 + $0x58] sm:$0xff]  ;;  %v450_v46 = vld [vmem:[%s1219_s3 + $0x60] sm:$0xff]  ;;  %v451_v47 = vld [vmem:[%s1219_s3 + $0x68] sm:$0xff] }
  0x3b   :  { %908 = vmatpush3.bf16.msra.mxu0 %v907_v54  ;;  %v952_v45 = vpack.c.bf16 %v449_v44, %v448_v43  ;;  %v955_v48 = vpack.c.bf16 %v451_v47, %v450_v46  ;;  %v452_v49 = vld [vmem:[%s1219_s3 + $0x70] sm:$0xff]  ;;  %v453_v51 = vld [vmem:[%s1219_s3 + $0x78] sm:$0xff]  ;;  %v532_v53 = vld [vmem:[%s1221_s5] sm:$0xff] }
  0x3c   :  { %910 = vmatprep.subr.bf16.mxu0 %v909_v55  ;;  %781 = vmatmul.mubr.msk.f32.vlgmr.msra.gmra.mrb[2].mxu1 %vm153_vm1, %v47_v61  ;;  %v958_v52 = vpack.c.bf16 %v453_v51, %v452_v49  ;;  %v533_v54 = vld [vmem:[%s1221_s5 + $0x8] sm:$0xff]  ;;  %v534_v55 = vld [vmem:[%s1221_s5 + $0x10] sm:$0xff]  ;;  %v535_v57 = vld [vmem:[%s1221_s5 + $0x18] sm:$0xff] }
  0x3d   :  { %815 = vmatprep.mubr.msk.f32.mxu1 %vm1031_vm0, %v1032_v60  ;;  %938 = vmatpush3.bf16.msra.mxu1 %v937_v31  ;;  %v961_v56 = vpack.c.bf16 %v533_v54, %v532_v53  ;;  %v964_v58 = vpack.c.bf16 %v535_v57, %v534_v55  ;;  %v536_v59 = vld [vmem:[%s1221_s5 + $0x20] sm:$0xff]  ;;  %v538_v14 = vld [vmem:[%s1221_s5 + $0x30] sm:$0xff]  ;;  %v539_v15 = vld [vmem:[%s1221_s5 + $0x38] sm:$0xff] }
  0x3e   :  { %939 = vmatprep.subr.bf16.mxu1 %v1030_v50 }
  0x3f   :  { %912 = vmatpush3.bf16.msra.mxu0 %v911_v62 }
  0x40   :  { %914 = vmatprep.subr.bf16.mxu0 %v913_v63  ;;  %v637_v63 = vld [vmem:[%s1218_s2] ss:$0 sm:$0xff] }
  0x41   :  { %941 = vmatpush3.bf16.msra.mxu1 %v940_v33 }
  0x42   :  { %942 = vmatprep.subr.bf16.mxu1 %v1030_v50 }
  0x43   :  { %916 = vmatpush3.bf16.msra.mxu0 %v915_v4 }
  0x44   :  { %918 = vmatprep.subr.bf16.mxu0 %v917_v5 }
  0x45   :  { %944 = vmatpush3.bf16.msra.mxu1 %v943_v36 }
  0x46   :  { %945 = vmatprep.subr.bf16.mxu1 %v1030_v50 }
  0x47   :  { %920 = vmatpush3.bf16.msra.mxu0 %v919_v10 }
  0x48   :  { %922 = vmatprep.subr.bf16.mxu0 %v921_v11 }
  0x49   :  { %947 = vmatpush3.bf16.msra.mxu1 %v946_v39 }
  0x4a   :  { %948 = vmatprep.subr.bf16.mxu1 %v1030_v50 }
  0x4b   :  { %924 = vmatpush3.bf16.msra.mxu0 %v923_v16  ;;  %v970_v16 = vpack.c.bf16 %v539_v15, %v538_v14 }
  0x4c   :  { %926 = vmatprep.subr.bf16.mxu0 %v925_v17  ;;  %v639_v17 = vld [vmem:[%s1220_s4] ss:$0 sm:$0xff] }
  0x4d   :  { %950 = vmatpush3.bf16.msra.mxu1 %v949_v42 }
  0x4e   :  { %951 = vmatprep.subr.bf16.mxu1 %v1030_v50 }
  0x4f   :  { %928 = vmatpush3.bf16.msra.mxu0 %v927_v22  ;;  %v640_v22 = vld [vmem:[%s1222_s6] ss:$0 sm:$0xff] }
  0x50   :  { %930 = vmatprep.subr.bf16.mxu0 %v929_v23 }
  0x51   :  { %953 = vmatpush3.bf16.msra.mxu1 %v952_v45 }
  0x52   :  { %954 = vmatprep.subr.bf16.mxu1 %v1030_v50 }
  0x53   :  { %932 = vmatpush3.bf16.msra.mxu0 %v931_v26 }
  0x54   :  { %960 = vmatprep.subr.bf16.mxu0 %v1030_v50 }
  0x55   :  { %956 = vmatpush3.bf16.msra.mxu1 %v955_v48 }
  0x56   :  { %362 = vmatmul.mubr.f32.vlgmr.msra.gmra.mrb[2].mxu0 %v45_v27  ;;  %957 = vmatprep.subr.bf16.mxu1 %v1030_v50 }
  0x57   :  { %834 = vmatprep.mubr.msk.f32.mxu0 %vm1031_vm0, %v1032_v60  ;;  %962 = vmatpush3.bf16.msra.mxu0 %v961_v56  ;;  %v537_v60 = vld [vmem:[%s1221_s5 + $0x28] sm:$0xff]  ;;  %s1001_s5 = scalar_lea.vmem %s629_s8, 128 }
  0x58   :  { %963 = vmatprep.subr.bf16.mxu0 %v1030_v50  ;;  %v967_v61 = vpack.c.bf16 %v537_v60, %v536_v59  ;;  %p1002_p8 = scmp.ne.s32.totalorder %s629_s8, %s1001_s5  ;;  %p1007_p10 = scmp.lt.s32.totalorder %s1001_s5, %s1001_s5 }
  0x59   :  { %959 = vmatpush3.bf16.msra.mxu1 %v958_v52 }
  0x5a   :  { %p1008_p11 = por %p1007_p10, %p1006_p9 }
  0x5b   :  { %965 = vmatpush3.bf16.msra.mxu0 %v964_v58 }
  0x5c   :  { %966 = vmatprep.subr.bf16.mxu0 %v1030_v50  ;;  %p1009_p12 = pnand %p1008_p11, %p1002_p8 }
  0x5f   :  { %968 = vmatpush3.bf16.msra.mxu0 %v967_v61 }
  0x60   :  { %969 = vmatprep.subr.bf16.mxu0 %v1030_v50 }
  0x63   :  { %971 = vmatpush3.bf16.msra.mxu0 %v970_v16 }
 0x109   :  { %v674_v62 = vpop.f32.mrb[0].mxu0 }
 0x10a   :  { %v675_v0 = vpop.f32.mrb[1].mxu0 }
 0x10b   :  { %v709_v1 = vpop.f32.mrb[0].mxu1  ;;  %v676_v2 = vadd.f32 %v675_v0, %v674_v62 }
 0x10c   :  { %v710_v3 = vpop.f32.mrb[1].mxu1 }
 0x10d   :  { %v711_v4 = vadd.f32 %v710_v3, %v709_v1  ;;  %v224_v5 = vadd.f32 %v676_v2, %v637_v63 }
 0x10f   :  { %v294_v6 = vadd.f32 %v711_v4, %v224_v5  ;;  %v433_v7 = vpop.f32.mrb[2].mxu1 }
 0x110   :  { %v782_v8 = vpop.f32.mrb[3].mxu1 }
 0x129   :  { %v744_v9 = vpop.f32.mrb[2].mxu0 }
 0x12a   :  { %v745_v10 = vpop.f32.mrb[3].mxu0 }
 0x12b   :  { %v746_v11 = vadd.f32 %v745_v10, %v744_v9 }
 0x12d   :  { %v364_v12 = vadd.f32 %v746_v11, %v294_v6 }
 0x12f   :  { %v434_v13 = vadd.f32 %v433_v7, %v364_v12 }
 0x131   :  { %v437_v50 = vmax.f32 %v434_v13, 0.0 }
 0x133   :  { %816 = vmatmul.mubr.f32.vlgmr.msra.gmra.mrb[4].mxu1 %v437_v50 }
 0x206   :  { %v527_v18 = vpop.f32.mrb[4].mxu1 }
 0x207   :  { %v528_v19 = vadd.f32 %v639_v17, %v527_v18  ;;  %v817_v20 = vpop.f32.mrb[5].mxu1 }
 0x209   :  { %v531_v21 = vmax.f32 %v528_v19, 0.0 }
 0x20b   :  { %835 = vmatmul.mubr.msk.f32.vlgmr.msra.gmra.mrb[4].mxu0 %vm547_vm2, %v531_v21 }
 0x2de   :  { %v617_v23 = vpop.f32.mrb[4].mxu0 }
 0x2df   :  { %v618_v24 = vadd.f32 %v640_v22, %v617_v23  ;;  %v836_v25 = vpop.f32.mrb[5].mxu0 }
 0x2e1   :  { %621 = vst [vmem:[#allocation5] sm:$0xff] %v618_v24 }
 0x2e2   :  { %1012 = shalt.err (!%p1009_p12)
}
 0x2e3   :  { %s1013_s10 = scalar_lea.hbm %s1223_s7, 128 }
 0x2e4   :  { %p1014_p13 = scmp.ne.s32.totalorder %s1223_s7, %s1013_s10  ;;  %p1017_p0 = scmp.lt.u32.totalorder %s1013_s10, %s1223_s7 }
 0x2e6   :  { %p1019_p1 = pnand %p1017_p0, %p1014_p13 }
 0x2e8   :  { %1022 = shalt.err (!%p1019_p1)
}
 0x2e9   :  { %631 = dma.vmem_to_hbm [thread:$0]  %s629_s8, 128, %s1223_s7, [#allocation4]  }
 0x2ea   :  { %1025 = dma.done.wait [#allocation4], 128  }
 0x2eb   :  { %1026 = vsyncadd [#allocation4], 4294967168 }
 0x2ec   :  { %635 = vsyncpa [#allocation3], 1 }
 0x2ed   :  { %636 = vsyncpa [#allocation4], 1 }

</bundles_post_ra>
